<compile_context>
chip_gen: v6e
topology: v6e:2x2x1
jax: 0.10.0
libtpu: 0.0.40
codegen_flags: <defaults>
</compile_context>

<pallas_src>
import functools
import math

import jax
import jax.numpy as jnp
from jax import lax
from jax.experimental import pallas as pl
from jax.experimental.pallas import tpu as pltpu

_GELU_C = math.sqrt(2.0 / math.pi)
_NEG_INF = -1e10
_LN_EPS = 1e-6


def _vmem_limit_bytes():
    # v5e/v6e: 128 MiB physical VMEM -> large scoped limit lets mem-bound
    # kernels use big row tiles; v7x: 64 MiB physical -> stay conservative.
    try:
        cap = int(pltpu.get_tpu_info().vmem_capacity_bytes)
        return min(cap * 3 // 4, 96 * 1024 * 1024)
    except Exception:
        return 32 * 1024 * 1024


VMEM_LIMIT = _vmem_limit_bytes()


def _row_tile(m, target=512):
    """Largest row tile <= target that divides m and is a multiple of 8 (or m)."""
    if m <= target:
        return m
    for t in range(target - target % 8, 7, -8):
        if m % t == 0:
            return t
    return m


def _gelu(x):
    # exact tanh-approx formula from the PyTorch module
    return 0.5 * x * (1.0 + jnp.tanh(_GELU_C * (x + 0.044715 * x * x * x)))


def _layernorm(x, gamma, beta, eps):
    mean = jnp.mean(x, axis=-1, keepdims=True)
    xc = x - mean
    var = jnp.mean(xc * xc, axis=-1, keepdims=True)
    return xc * lax.rsqrt(var + eps) * gamma + beta


# ----------------------------------------------------------------------------
# Fused linear kernel: y = act( LN?(x) @ W + b ) [+ LN?(residual)]
#   W is pre-transposed to (K, N) on the host.
# ----------------------------------------------------------------------------
def _make_fused_linear_kernel(*, activation, ln_in, has_residual, ln_residual, eps):
    def kernel(*refs):
        it = iter(refs)
        x_ref = next(it)
        if ln_in:
            g_ref, be_ref = next(it), next(it)
        w_ref, b_ref = next(it), next(it)
        if has_residual:
            r_ref = next(it)
            if ln_residual:
                rg_ref, rbe_ref = next(it), next(it)
        o_ref = next(it)

        x = x_ref[...].astype(jnp.float32)
        if ln_in:
            x = _layernorm(x, g_ref[...], be_ref[...], eps)
        # (M,K) x (K,N) straight into the MXU; cast to weight dtype so bf16
        # weights (large-model path) feed the MXU directly, accumulate f32.
        y = jnp.dot(x.astype(w_ref.dtype), w_ref[...],
                    preferred_element_type=jnp.float32)
        y = y + b_ref[...]
        if activation == "gelu":
            y = _gelu(y)
        if has_residual:
            r = r_ref[...].astype(jnp.float32)
            if ln_residual:
                r = _layernorm(r, rg_ref[...], rbe_ref[...], eps)
            y = y + r
        o_ref[...] = y.astype(o_ref.dtype)

    return kernel


def pallas_fused_linear(x, w_kn, b, *, gamma=None, beta=None, activation=None,
                        residual=None, res_gamma=None, res_beta=None,
                        eps=_LN_EPS):
    """x: (M, K), w_kn: (K, N), b: (N,) -> (M, N)."""
    M, K = x.shape
    N = w_kn.shape[1]
    tm = _row_tile(M)
    ln_in = gamma is not None
    has_res = residual is not None
    ln_res = res_gamma is not None

    def const(shape):
        return pl.BlockSpec(shape, lambda i: (0,) * len(shape))

    args = [x]
    in_specs = [pl.BlockSpec((tm, K), lambda i: (i, 0))]
    if ln_in:
        args += [gamma.reshape(1, K), beta.reshape(1, K)]
        in_specs += [const((1, K)), const((1, K))]
    args += [w_kn, b.reshape(1, N)]
    in_specs += [const((K, N)), const((1, N))]
    if has_res:
        args.append(residual)
        in_specs.append(pl.BlockSpec((tm, N), lambda i: (i, 0)))
        if ln_res:
            args += [res_gamma.reshape(1, N), res_beta.reshape(1, N)]
            in_specs += [const((1, N)), const((1, N))]

    kernel = _make_fused_linear_kernel(activation=activation, ln_in=ln_in,
                                       has_residual=has_res,
                                       ln_residual=ln_res, eps=eps)
    cost = pl.CostEstimate(
        flops=2 * M * N * K,
        transcendentals=(M * N if activation == "gelu" else 0),
        bytes_accessed=4 * (M * K + K * N + M * N + (M * N if has_res else 0)),
    )
    return pl.pallas_call(
        kernel,
        out_shape=jax.ShapeDtypeStruct((M, N), x.dtype),
        grid=(M // tm,),
        in_specs=in_specs,
        out_specs=pl.BlockSpec((tm, N), lambda i: (i, 0)),
        compiler_params=pltpu.CompilerParams(
            dimension_semantics=("parallel",),
            vmem_limit_bytes=VMEM_LIMIT),
        cost_estimate=cost,
    )(*args)


# ----------------------------------------------------------------------------
# Attention kernel: one batch element per grid step.
# Consumes the fused (1, S, 3D) Q|K|V block, builds the causal/padding mask
# in-kernel from a thin (1,1,S) padding row, writes a lane-dense (1,S,D) ctx.
# ----------------------------------------------------------------------------
def _make_attention_kernel(*, heads, d_model, causal, scale):
    dh = d_model // heads

    def kernel(qkv_ref, pad_ref, o_ref):
        qkv = qkv_ref[0].astype(jnp.float32)          # (S, 3D)
        seq = qkv.shape[0]
        pad = pad_ref[0]                              # (1, S) float, 0 => masked
        col_masked = pad == 0.0                       # (1, S) bool
        if causal:
            row = lax.broadcasted_iota(jnp.int32, (seq, seq), 0)
            col = lax.broadcasted_iota(jnp.int32, (seq, seq), 1)
            masked = (col > row) | col_masked
        else:
            masked = jnp.broadcast_to(col_masked, (seq, seq))

        ctx = []
        for h in range(heads):                        # static unroll over heads
            q = qkv[:, h * dh:(h + 1) * dh] * scale
            k = qkv[:, d_model + h * dh: d_model + (h + 1) * dh]
            v = qkv[:, 2 * d_model + h * dh: 2 * d_model + (h + 1) * dh]
            s = lax.dot_general(q, k, (((1,), (1,)), ((), ())),
                                preferred_element_type=jnp.float32)  # q @ k.T
            s = jnp.where(masked, _NEG_INF, s)
            m = jnp.max(s, axis=-1, keepdims=True)
            e = jnp.exp(s - m)
            # Exact divide keeps the 1e-4 check tight; at scale use
            # pl.reciprocal(denom, approx=True) to move it onto the EUP slot.
            attn = e / jnp.sum(e, axis=-1, keepdims=True)
            ctx.append(jnp.dot(attn, v, preferred_element_type=jnp.float32))
        o_ref[0] = jnp.concatenate(ctx, axis=-1).astype(o_ref.dtype)

    return kernel


def pallas_attention(qkv, pad_mask, *, heads, causal):
    """qkv: (B, S, 3*D) fused Q|K|V; pad_mask: (B, 1, S) float (0 = masked)."""
    B, S, three_d = qkv.shape
    D = three_d // 3
    kernel = _make_attention_kernel(heads=heads, d_model=D, causal=causal,
                                    scale=1.0 / math.sqrt(D // heads))
    return pl.pallas_call(
        kernel,
        out_shape=jax.ShapeDtypeStruct((B, S, D), qkv.dtype),
        grid=(B,),
        in_specs=[pl.BlockSpec((1, S, three_d), lambda b: (b, 0, 0)),
                  pl.BlockSpec((1, 1, S), lambda b: (b, 0, 0))],
        out_specs=pl.BlockSpec((1, S, D), lambda b: (b, 0, 0)),
        compiler_params=pltpu.CompilerParams(
            dimension_semantics=("parallel",),
            vmem_limit_bytes=VMEM_LIMIT),
    )(qkv, pad_mask)


# ----------------------------------------------------------------------------
# Positional encoding + speaker embedding add (speaker kept (B,1,D))
# ----------------------------------------------------------------------------
def _posenc_kernel(x_ref, pe_ref, spk_ref, o_ref):
    o_ref[...] = x_ref[...] + pe_ref[...][None] + spk_ref[...]


def pallas_add_pos_speaker(x, pe, speaker):
    """x: (B,S,D); pe: (S,D); speaker broadcastable to (B,1,D)."""
    B, S, D = x.shape
    speaker = jnp.broadcast_to(speaker, (B, 1, D)).astype(x.dtype)
    return pl.pallas_call(
        _posenc_kernel,
        out_shape=jax.ShapeDtypeStruct((B, S, D), x.dtype),
        grid=(B,),
        in_specs=[pl.BlockSpec((1, S, D), lambda b: (b, 0, 0)),
                  pl.BlockSpec((S, D), lambda b: (0, 0)),
                  pl.BlockSpec((1, 1, D), lambda b: (b, 0, 0))],
        out_specs=pl.BlockSpec((1, S, D), lambda b: (b, 0, 0)),
        compiler_params=pltpu.CompilerParams(
            dimension_semantics=("parallel",),
            vmem_limit_bytes=VMEM_LIMIT),
    )(x, pe, speaker)


# ----------------------------------------------------------------------------
# Model assembly (Pallas forward)
# ----------------------------------------------------------------------------
def encoder_layer(i, p, a_flat, b_flat, pad_mask, *, heads, causal, same, B, S, D):
    M = B * S
    ln_g, ln_b = p["ln_attn"]
    use_ln = (i != 0)

    if same:
        # LayerNorm fused into the joint Q|K|V projection.
        qkv = pallas_fused_linear(
            b_flat, p["w_qkv"], p["b_qkv"],
            gamma=ln_g if use_ln else None, beta=ln_b if use_ln else None)
    else:
        # Cross path: Q from (LN of) inputs_b, K/V from raw inputs_a.
        q = pallas_fused_linear(
            b_flat, p["w_q"], p["b_q"],
            gamma=ln_g if use_ln else None, beta=ln_b if use_ln else None)
        kv = pallas_fused_linear(a_flat, p["w_kv"], p["b_kv"])
        qkv = jnp.concatenate([q, kv], axis=-1)  # TODO(synk): avoid this copy

    ctx = pallas_attention(qkv.reshape(B, S, 3 * D), pad_mask,
                           heads=heads, causal=causal)

    # Out-projection with the residual (LN of inputs_b, recomputed in-kernel;
    # dropout on the context is identity in eval mode).
    out = pallas_fused_linear(
        ctx.reshape(M, D), p["w_o"], p["b_o"],
        residual=b_flat,
        res_gamma=ln_g if use_ln else None,
        res_beta=ln_b if use_ln else None)

    # FFN: LayerNorm fused into w_1, gelu fused, residual fused into w_2.
    f_g, f_b = p["ln_ffn"]
    inter = pallas_fused_linear(out, p["w_1"], p["b_1"],
                                gamma=f_g, beta=f_b, activation="gelu")
    return pallas_fused_linear(inter, p["w_2"], p["b_2"], residual=out)


def transformer_encoder_forward(params, x_a, x_b, mask, speaker_emb, setting,
                                heads, layers, same_inputs=None):
    B, S, D = x_b.shape
    if same_inputs is None:
        same_inputs = x_a is x_b      # static decision: no device sync, jit-safe
    causal = (setting == "realtime")
    pad_mask = mask.astype(jnp.float32).reshape(B, 1, S)

    pe = params["pe"][:S]
    if same_inputs:
        h = pallas_add_pos_speaker(x_b, pe, speaker_emb)   # dropout = identity
        a_flat = None
    else:
        a = pallas_add_pos_speaker(x_a, pe, speaker_emb)
        h = pallas_add_pos_speaker(x_b, pe, speaker_emb)
        a_flat = a.reshape(B * S, D)

    h_flat = h.reshape(B * S, D)
    for i in range(layers):
        h_flat = encoder_layer(i, params["layers"][i], a_flat, h_flat, pad_mask,
                               heads=heads, causal=causal, same=same_inputs,
                               B=B, S=S, D=D)
    return h_flat.reshape(B, S, D)


# ----------------------------------------------------------------------------
# Parameters
# ----------------------------------------------------------------------------
def init_params(key, d_model, d_ff, heads, layers, max_len=512):
    position = jnp.arange(max_len, dtype=jnp.float32)[:, None]
    div_term = jnp.exp(jnp.arange(0, d_model, 2, dtype=jnp.float32)
                       * (-math.log(10000.0) / d_model))
    pe = jnp.zeros((max_len, d_model), jnp.float32)
    pe = pe.at[:, 0::2].set(jnp.sin(position * div_term))
    pe = pe.at[:, 1::2].set(jnp.cos(position * div_term))

    def linear(k, out_dim, in_dim):
        kw, kb = jax.random.split(k)
        bound = 1.0 / math.sqrt(in_dim)
        w = jax.random.uniform(kw, (out_dim, in_dim), jnp.float32, -bound, bound)
        b = jax.random.uniform(kb, (out_dim,), jnp.float32, -bound, bound)
        return w, b

    layer_params = []
    for lk in jax.random.split(key, layers):
        k1, k2, k3, k4, k5, k6 = jax.random.split(lk, 6)
        layer_params.append({
            "wq": linear(k1, d_model, d_model),
            "wk": linear(k2, d_model, d_model),
            "wv": linear(k3, d_model, d_model),
            "wo": linear(k4, d_model, d_model),
            "ffn_w1": linear(k5, d_ff, d_model),
            "ffn_w2": linear(k6, d_model, d_ff),
            "ln_attn": (jnp.ones((d_model,), jnp.float32),
                        jnp.zeros((d_model,), jnp.float32)),
            "ln_ffn": (jnp.ones((d_model,), jnp.float32),
                       jnp.zeros((d_model,), jnp.float32)),
        })
    return {"pe": pe, "layers": layer_params}


def prepare_pallas_params(params):
    """One-time host-side prep: transpose weights to (K,N), fuse Q|K|V / K|V."""
    prepared = {"pe": params["pe"], "layers": []}
    for p in params["layers"]:
        wq, bq = p["wq"]
        wk, bk = p["wk"]
        wv, bv = p["wv"]
        wo, bo = p["wo"]
        w1, b1 = p["ffn_w1"]
        w2, b2 = p["ffn_w2"]
        prepared["layers"].append({
            "w_qkv": jnp.concatenate([wq.T, wk.T, wv.T], axis=1),  # (D, 3D)
            "b_qkv": jnp.concatenate([bq, bk, bv]),
            "w_q": jnp.asarray(wq.T), "b_q": bq,
            "w_kv": jnp.concatenate([wk.T, wv.T], axis=1),          # (D, 2D)
            "b_kv": jnp.concatenate([bk, bv]),
            "w_o": jnp.asarray(wo.T), "b_o": bo,
            "w_1": jnp.asarray(w1.T), "b_1": b1,
            "w_2": jnp.asarray(w2.T), "b_2": b2,
            "ln_attn": p["ln_attn"],
            "ln_ffn": p["ln_ffn"],
        })
    return prepared


# ----------------------------------------------------------------------------
# Pure-JAX reference (mirror of the PyTorch forward)
# ----------------------------------------------------------------------------
def reference_forward(params, x_a, x_b, mask, speaker_emb, setting, heads,
                      layers, same_inputs=True):
    B, S, D = x_a.shape
    if setting == "realtime":
        causal = jnp.tril(jnp.ones((S, S), dtype=bool))
        padding = mask.astype(bool)[:, None, :]
        inverted = ~(causal[None, :, :] & padding)
    else:
        inverted = jnp.broadcast_to((mask == 0)[:, None, :], (B, S, S))

    def layernorm(x, g, b, eps=_LN_EPS):
        mean = jnp.mean(x, -1, keepdims=True)
        var = jnp.mean((x - mean) ** 2, -1, keepdims=True)
        return (x - mean) / jnp.sqrt(var + eps) * g + b

    def linear(x, wb):
        w, b = wb
        return x @ w.T + b

    def mha(p, key_in, value_in, query_in):
        dh = D // heads

        def shp(x):
            return x.reshape(B, S, heads, dh).transpose(0, 2, 1, 3)

        k = shp(linear(key_in, p["wk"]))
        v = shp(linear(value_in, p["wv"]))
        q = shp(linear(query_in, p["wq"])) / math.sqrt(dh)
        scores = jnp.einsum("bhqd,bhkd->bhqk", q, k)
        scores = jnp.where(inverted[:, None, :, :], _NEG_INF, scores)
        attn = jax.nn.softmax(scores, axis=-1)
        ctx = jnp.einsum("bhqk,bhkd->bhqd", attn, v)
        ctx = ctx.transpose(0, 2, 1, 3).reshape(B, S, D)
        return linear(ctx, p["wo"])

    def ffn(p, x):
        ln = layernorm(x, *p["ln_ffn"])
        inter = _gelu(linear(ln, p["ffn_w1"]))
        return linear(inter, p["ffn_w2"]) + x

    pe = params["pe"][:S]
    spk = jnp.broadcast_to(speaker_emb, x_b.shape)
    if same_inputs:
        h = x_b + pe[None] + spk
        a = h
    else:
        a = x_a + pe[None] + spk
        h = x_b + pe[None] + spk
    for i in range(layers):
        p = params["layers"][i]
        hb = layernorm(h, *p["ln_attn"]) if i != 0 else h
        ctx = mha(p, hb, hb, hb) if same_inputs else mha(p, a, a, hb)
        h = ffn(p, ctx + hb)
    return h


if __name__ == "__main__":
    B, S = 2, 8
    d_model, d_ff, heads, layers = 32, 128, 4, 2

    key = jax.random.PRNGKey(0)
    kx, ks, kp = jax.random.split(key, 3)
    x = jax.random.normal(kx, (B, S, d_model), dtype=jnp.float32)
    speaker_emb = jax.random.normal(ks, (B, 1, d_model), dtype=jnp.float32)
    mask = jnp.ones((B, S), dtype=jnp.float32)      # all tokens valid
    params = init_params(kp, d_model, d_ff, heads, layers)
    pparams = prepare_pallas_params(params)

    out = transformer_encoder_forward(pparams, x, x, mask, speaker_emb,
                                      setting="realtime", heads=heads,
                                      layers=layers, same_inputs=True)
    out = jax.block_until_ready(out)

    ref = reference_forward(params, x, x, mask, speaker_emb,
                            setting="realtime", heads=heads, layers=layers,
                            same_inputs=True)
    assert out.shape == (B, S, d_model)
    assert jnp.allclose(out, ref, atol=1e-4, rtol=1e-4), \
        float(jnp.max(jnp.abs(out - ref)))

    print("KERNEL_OK")
</pallas_src>

<mosaic_0001>
module attributes {stable_mosaic.version = 11 : i64} {
  func.func @_posenc_kernel(%arg0: i32, %arg1: memref<1x8x32xf32, #tpu.memory_space<vmem>>, %arg2: memref<8x32xf32, #tpu.memory_space<vmem>>, %arg3: memref<1x1x32xf32, #tpu.memory_space<vmem>>, %arg4: memref<1x8x32xf32, #tpu.memory_space<vmem>>) attributes {dimension_semantics = [#tpu.dimension_semantics<parallel>], iteration_bounds = array<i64: 2>, scalar_prefetch = 0 : i64, scratch_operands = 0 : i64, tpu.core_type = #tpu.core_type<tc>, window_params = [{transform_indices = @transform_0, window_bounds = array<i64: 1, 8, 32>}, {pipeline_mode = #tpu.pipeline_mode<synchronous>, transform_indices = @transform_1, window_bounds = array<i64: 8, 32>}, {transform_indices = @transform_2, window_bounds = array<i64: 1, 1, 32>}, {transform_indices = @transform_3, window_bounds = array<i64: 1, 8, 32>}]} {
    %c0 = arith.constant 0 : index
    %c0_0 = arith.constant 0 : index
    %c0_1 = arith.constant 0 : index
    %0 = vector.load %arg1[%c0, %c0_0, %c0_1] : memref<1x8x32xf32, #tpu.memory_space<vmem>>, vector<1x8x32xf32>
    %c0_2 = arith.constant 0 : index
    %c0_3 = arith.constant 0 : index
    %1 = vector.load %arg2[%c0_2, %c0_3] : memref<8x32xf32, #tpu.memory_space<vmem>>, vector<8x32xf32>
    %2 = vector.shape_cast %1 : vector<8x32xf32> to vector<1x8x32xf32>
    %3 = arith.addf %0, %2 : vector<1x8x32xf32>
    %c0_4 = arith.constant 0 : index
    %c0_5 = arith.constant 0 : index
    %c0_6 = arith.constant 0 : index
    %4 = vector.load %arg3[%c0_4, %c0_5, %c0_6] : memref<1x1x32xf32, #tpu.memory_space<vmem>>, vector<1x1x32xf32>
    %5 = vector.broadcast %4 : vector<1x1x32xf32> to vector<1x8x32xf32>
    %6 = arith.addf %3, %5 : vector<1x8x32xf32>
    %c0_7 = arith.constant 0 : index
    %c0_8 = arith.constant 0 : index
    %c0_9 = arith.constant 0 : index
    %7 = vector.load %arg4[%c0_7, %c0_8, %c0_9] : memref<1x8x32xf32, #tpu.memory_space<vmem>>, vector<1x8x32xf32>
    tpu.vector_store %arg4[%c0_7, %c0_8, %c0_9], %6 {strides = array<i32>} : memref<1x8x32xf32, #tpu.memory_space<vmem>>, vector<1x8x32xf32>,
    return
  }
  func.func @transform_0(%arg0: i32) -> (i32, i32, i32) {
    %c0_i32 = arith.constant 0 : i32
    %c0_i32_0 = arith.constant 0 : i32
    %c0_i32_1 = arith.constant 0 : i32
    return %arg0, %c0_i32, %c0_i32_0 : i32, i32, i32
  }
  func.func @transform_1(%arg0: i32) -> (i32, i32) {
    %c0_i32 = arith.constant 0 : i32
    %c0_i32_0 = arith.constant 0 : i32
    %c0_i32_1 = arith.constant 0 : i32
    return %c0_i32, %c0_i32_0 : i32, i32
  }
  func.func @transform_2(%arg0: i32) -> (i32, i32, i32) {
    %c0_i32 = arith.constant 0 : i32
    %c0_i32_0 = arith.constant 0 : i32
    %c0_i32_1 = arith.constant 0 : i32
    return %arg0, %c0_i32, %c0_i32_0 : i32, i32, i32
  }
  func.func @transform_3(%arg0: i32) -> (i32, i32, i32) {
    %c0_i32 = arith.constant 0 : i32
    %c0_i32_0 = arith.constant 0 : i32
    %c0_i32_1 = arith.constant 0 : i32
    return %arg0, %c0_i32, %c0_i32_0 : i32, i32, i32
  }
}

</mosaic_0001>

<bundles_post_ra>
// kernel: tpu_custom_call.1
= control target key start
LH: loop header
LB: loop body
LE: loop exit
PB: predicated region body
PF: predicated region fallthrough
CT: control target
= control target key end

     0   :  { %8 = vsyncpa [#allocation3], 0  ;;  %s719_s0 = inlined_call_operand.hbm [shape: f32[2,8,32], index: 0, kind: input, shape index: {}]   ;;  %s720_s1 = inlined_call_operand.hbm [shape: f32[8,32], index: 1, kind: input, shape index: {}]   ;;  %s721_s2 = inlined_call_operand.vmem [shape: f32[2,1,32], index: 2, kind: input, shape index: {}]   ;;  %s722_s3 = inlined_call_operand.hbm [shape: f32[2,8,32], index: 3, kind: output, shape index: {}]  }
   0x1   :  { %10 = vsyncpa [#allocation3 + $0x1], 0 }
   0x2   :  { %11 = vsyncpa [#allocation6], 0 }
   0x3   :  { %12 = vsyncpa [#allocation4], 0 }
   0x4   :  { %14 = vsyncpa [#allocation4 + $0x1], 0  ;;  %s548_s12 = smov 0   ;;  %s550_s13 = smov 0  }
   0x5   :  { %s552_s14 = smov 0   ;;  %s554_s15 = smov 0  }
   0x6 LB: > { %s569_s16 = sadd.s32 4294967295, %s523_s15   ;;  %s329_s17 = sadd.s32 4294967294, %s523_s15   ;;  %s523_s15 = sphi %s554_s15, %s745_s15   ;;  %s519_s14 = sphi %s552_s14, %s744_s14   ;;  %s515_s13 = sphi %s550_s13, %s743_s13   ;;  %s511_s12 = sphi %s548_s12, %s742_s12  }
   0x7   : > { %p40_p0 = scmp.ne.s32.totalorder %s515_s13, %s511_s12  ;;  %p723_p1 = scmp.eq.s32.totalorder %s569_s16, 0 }
   0x8   : > { %p117_p3 = scmp.eq.s32.totalorder %s329_s17, 1  ;;  %p330_p5 = scmp.ge.s32.totalorder %s523_s15, 1 }
   0x9   : > { %p578_p4 = por %p723_p1, %p40_p0  ;;  %p124_p7 = scmp.lt.s32.totalorder %s523_s15, 3 }
   0xa   : > { %p583_p6 = por %p117_p3, %p40_p0  ;;  %s525_s21 = smov [#allocation5]  }
   0xb   : > { %s727_s18 = scalar_select %p578_p4, 1, 0 }
   0xc   : > { %s728_s19 = scalar_select %p583_p6, 1, 0 }
   0xd   : > { %p588_p8 = pnand %p330_p5, %p124_p7  ;;  %s137_s22 = sshll.u32 %s525_s21, 4  ;;  %s138_s22 = int_to_ptr.vmem [resolvable:$true] %s137_s22 }
   0xe   : > { %s596_s23 = sadd.s32 1, %s523_s15   ;;  %s27_s27 = sadd.s32 1, %s519_s14 }
   0xf   : > { %s729_s20 = scalar_select %p588_p8, 1, 0 }
  0x10   : > { %p352_p10 = pneg %p588_p8  ;;  %s24_s25 = ssub.s32 %s523_s15, %s596_s23 }
  0x11   : > { %p606_p12 = scmp.eq.s32.totalorder %s24_s25, 0  ;;  %p34_p13 = scmp.ne.s32.totalorder %s519_s14, %s515_s13 }
  0x12   : > { %p600_p11 = pnand %p352_p10, %p723_p1  ;;  %s412_s28 = scalar_lea.vmem %s138_s22, 128 }
  0x13   : > { %p413_p3 = scmp.ne.s32.totalorder %s138_s22, %s412_s28  ;;  %p420_p9 = scmp.lt.s32.totalorder %s138_s22, %s138_s22 }
  0x14   : > { %p403_p0 = pneg %p600_p11  ;;  %p421_p2 = scmp.lt.s32.totalorder %s412_s28, %s412_s28 }
  0x16   : > { %p415_p5 = pnand %p413_p3, %p403_p0  ;;  %p422_p10 = por %p421_p2, %p420_p9 }
  0x18   : > { %p416_p7 = pneg %p415_p5 }
  0x1a   : > { %p423_p1 = pnand %p422_p10, %p416_p7 }
  0x1c   : > { %426 = shalt.err (!%p423_p1)
}
  0x1d   : > { %355 = dma.hbm_to_vmem [thread:$0]  (!%p600_p11), %s720_s1, 128, %s138_s22, [#allocation6]  }
  0x1e   : > { %s623_s4 = scalar_select %p606_p12, %s519_s14, %s27_s27  }
  0x1f   : > { %p35_p1 = scmp.eq.s32.totalorder %s523_s15, 0  ;;  %p732_p2 = scmp.eq.s32.totalorder %s569_s16, 1 }
  0x20   : > { %p365_p0 = scmp.lt.s32.totalorder %s523_s15, 2  ;;  %s148_s6 = sand.u32 1, %s519_s14  }
  0x21   : > { %p631_p9 = por %p732_p2, %p34_p13  ;;  %p36_p3 = por %p35_p1, %p34_p13 }
  0x22   : > { %s333_s7 = sshll.u32 %s148_s6, 3  ;;  %s334_s8 = sshll.u32 %s523_s15, 7 }
  0x23   : > { %s733_s5 = scalar_select %p631_p9, 1, 0 }
  0x24   : > { %s644_s11 = scalar_lea.hbm %s719_s0, %s334_s8  ;;  %s152_s17 = scalar_lea.vmem [#allocation2], %s333_s7 }
  0x25   : > { %s159_s21 = sshll.u32 %s152_s17, 4  ;;  %p646_p11 = pnand %p365_p0, %p36_p3  ;;  %s160_s21 = int_to_ptr.vmem [resolvable:$true] %s159_s21 }
  0x26   : > { %s149_s24 = scalar_lea.sflag [#allocation3], %s148_s6  ;;  %s427_s25 = scalar_lea.hbm %s644_s11, 128 }
  0x27   : > { %p428_p12 = scmp.ne.s32.totalorder %s644_s11, %s427_s25  ;;  %p429_p13 = pneg %p646_p11 }
  0x28   : > { %s432_s28 = scalar_lea.hbm %s719_s0, 256  ;;  %p433_p10 = scmp.lt.s32.totalorder %s644_s11, %s719_s0 }
  0x29   : > { %p430_p5 = pnand %p429_p13, %p428_p12  ;;  %p434_p1 = scmp.lt.s32.totalorder %s432_s28, %s427_s25 }
  0x2b   : > { %p431_p7 = pneg %p430_p5  ;;  %p435_p2 = por %p434_p1, %p433_p10 }
  0x2d   : > { %p436_p0 = pnand %p435_p2, %p431_p7 }
  0x2f   : > { %439 = shalt.err (!%p436_p0)
}
  0x30   : > { %s440_s7 = scalar_lea.vmem %s160_s21, 128  ;;  %s526_s6 = smov [#allocation2]  }
  0x31   : > { %p441_p3 = scmp.ne.s32.totalorder %s160_s21, %s440_s7  ;;  %s445_s8 = sshll.u32 %s526_s6, 4  ;;  %s446_s8 = int_to_ptr.vmem [resolvable:$false] %s445_s8 }
  0x32   : > { %s447_s9 = scalar_lea.vmem %s446_s8, 256  ;;  %p448_p12 = scmp.lt.s32.totalorder %s160_s21, %s446_s8 }
  0x33   : > { %p443_p6 = pnand %p441_p3, %p429_p13  ;;  %p449_p5 = scmp.lt.s32.totalorder %s447_s9, %s440_s7 }
  0x35   : > { %p444_p9 = pneg %p443_p6  ;;  %p450_p4 = por %p449_p5, %p448_p12 }
  0x37   : > { %p451_p8 = pnand %p450_p4, %p444_p9 }
  0x39   : > { %454 = shalt.err (!%p451_p8)
}
  0x3a   : > { %359 = dma.hbm_to_vmem [thread:$0]  (!%p646_p11), %s644_s11, 128, %s160_s21, %s149_s24  }
  0x3b   : > { %p735_p7 = scmp.ne.s32.totalorder %s729_s20, 0 }
  0x3c   : > { %s667_s10 = sand.u32 (!%p735_p7), 1, %s515_s13   ;;  %p736_p6 = scmp.ne.s32.totalorder (!%p735_p7), %s727_s18, 0 }
  0x3d   : > { %174 = sbr.rel (%p735_p7) target bundleno = 97 (0x61), region = 32  ;;  %s336_s17 = sshll.u32 (!%p735_p7), %s667_s10, 3 }
  0x3e   : > { %s177_s25 = scalar_lea.sflag (!%p735_p7), [#allocation3], %s667_s10  ;;  %s180_s26 = scalar_lea.vmem (!%p735_p7), [#allocation2], %s336_s17 }
  0x42   : > { %498 = dma.done.wait (%p736_p6), %s177_s25, 128  }
  0x43   : > { %500 = vsyncadd (%p736_p6), %s177_s25, 4294967168  ;;  %p737_p4 = scmp.eq.s32.totalorder %s569_s16, 0 }
  0x45   : > { %502 = dma.done.wait (%p737_p4), [#allocation6], 128   ;;  %p738_p8 = pmov %p737_p4 }
  0x46   : > { %p210_p9 = scmp.lt.s32.totalorder %s569_s16, 1  ;;  %v213_v0 = vld [vmem:[%s180_s26] sm:$0xff]  ;;  %v214_v1 = vld [vmem:[#allocation5] sm:$0xff]  ;;  %s209_s18 = scalar_lea.vmem [#allocation7], %s336_s17  ;;  %vm224_vm0 = vcmask 261120  }
  0x47   : > { %504 = vsyncadd (%p738_p8), [#allocation6], 4294967168  ;;  %s240_s24 = sshll.u32 %s209_s18, 4  ;;  %s341_s27 = sshll.u32 %s569_s16, 7  ;;  %v215_v3 = vadd.f32 %v214_v1, %v213_v0  ;;  %s241_s24 = int_to_ptr.vmem [resolvable:$true] %s240_s24 }
  0x48   : > { %s211_s20 = scalar_select %p210_p9, %s569_s16, 1 }
  0x49   : > { %s238_s30 = scalar_lea.hbm %s722_s3, %s341_s27  ;;  %s227_s7 = scalar_lea.sflag [#allocation4], %s667_s10 }
  0x4a   : > { %s212_s22 = scalar_lea.vmem %s721_s2, %s211_s20  ;;  %s455_s6 = scalar_lea.vmem %s241_s24, 128 }
  0x4b   : > { %v339_v2 = vld [vmem:[%s212_s22] ss:$0 sm:$0xff]  ;;  %p456_p11 = scmp.ne.s32.totalorder %s241_s24, %s455_s6  ;;  %p739_p13 = scmp.ne.s32.totalorder %s733_s5, 0 }
  0x4c   : > { %v223_v4 = vadd.f32 %v339_v2, %v215_v3  ;;  %s527_s8 = smov [#allocation7]  }
  0x4d   : > { %p457_p10 = pnand %p456_p11, %p739_p13  ;;  %s459_s9 = sshll.u32 %s527_s8, 4  ;;  %s460_s9 = int_to_ptr.vmem [resolvable:$false] %s459_s9 }
  0x4e   : > { %225 = vst.msk [vmem:[%s209_s18] sm:$0xff] %vm224_vm0, %v223_v4  ;;  %s461_s17 = scalar_lea.vmem %s460_s9, 256  ;;  %p462_p2 = scmp.lt.s32.totalorder %s241_s24, %s460_s9 }
  0x4f   : > { %p458_p1 = pneg %p457_p10  ;;  %p463_p0 = scmp.lt.s32.totalorder %s461_s17, %s455_s6 }
  0x51   : > { %p464_p3 = por %p463_p0, %p462_p2 }
  0x53   : > { %p465_p12 = pnand %p464_p3, %p458_p1 }
  0x55   : > { %468 = shalt.err (!%p465_p12)
}
  0x56   : > { %s469_s16 = scalar_lea.hbm %s238_s30, 128  ;;  %s473_s26 = scalar_lea.hbm %s722_s3, 256 }
  0x57   : > { %p470_p5 = scmp.ne.s32.totalorder %s238_s30, %s469_s16  ;;  %p474_p4 = scmp.lt.s32.totalorder %s238_s30, %s722_s3 }
  0x58   : > { %p475_p8 = scmp.lt.s32.totalorder %s473_s26, %s469_s16 }
  0x59   : > { %p471_p7 = pnand %p470_p5, %p739_p13 }
  0x5a   : > { %p476_p9 = por %p475_p8, %p474_p4 }
  0x5b   : > { %p472_p6 = pneg %p471_p7 }
  0x5d   : > { %p477_p11 = pnand %p476_p9, %p472_p6 }
  0x5f   : > { %480 = shalt.err (!%p477_p11)
}
  0x60   : > { %350 = dma.vmem_to_hbm [thread:$0]  (%p739_p13), %s241_s24, 128, %s238_s30, %s227_s7  }
  0x61 PF: > { %s252_s21 = sand.u32 1, %s511_s12   ;;  %p740_p10 = scmp.ne.s32.totalorder %s728_s19, 0 }
  0x62   : > { %p741_p1 = scmp.ge.s32.totalorder %s523_s15, 2  ;;  %s253_s22 = scalar_lea.sflag [#allocation4], %s252_s21 }
  0x64   : > { %p361_p2 = pnand %p741_p1, %p740_p10 }
  0x66   : > { %p362_p0 = pneg %p361_p2 }
  0x68   : > { %506 = dma.done.wait (%p362_p0), %s253_s22, 128  }
  0x69   : > { %508 = vsyncadd (%p362_p0), %s253_s22, 4294967168  ;;  %p17_p3 = scmp.ge.s32.totalorder %s596_s23, 4   ;;  %s742_s12 = smov %s515_s13 }
  0x6a   : > { %s743_s13 = smov %s519_s14  ;;  %s744_s14 = smov %s623_s4 }
  0x6b   : > { %s745_s15 = smov %s596_s23  ;;  %19 = sbr.rel (!%p17_p3) target bundleno = 6 (0x6), region = 84 }
  0x70   :  { %258 = vsyncpa [#allocation3], 1 }
  0x71   :  { %260 = vsyncpa [#allocation3 + $0x1], 1 }
  0x72   :  { %261 = vsyncpa [#allocation6], 1 }
  0x73   :  { %262 = vsyncpa [#allocation4], 1 }
  0x74   :  { %264 = vsyncpa [#allocation4 + $0x1], 1 }

</bundles_post_ra>
